<compile_context>
chip_gen: v7x
topology: tpu7x:2x2x1
jax: 0.10.0
libtpu: 0.0.40
codegen_flags: <defaults>
</compile_context>

<pallas_src>
import functools

import jax
import jax.numpy as jnp
from jax import lax
from jax.experimental import pallas as pl
from jax.experimental.pallas import tpu as pltpu


# --------------------------------------------------------------------------- #
# Kernel
# --------------------------------------------------------------------------- #
def _esa_kernel(x_ref, wq_ref, bq_ref, wv_ref, bv_ref, *rest,
                n_heads, scale, batch_tile, seq_len):
    """Grid = (B // batch_tile,).  One block of `batch_tile` batch elements per step."""
    if n_heads > 1:
        bones_ref, wo_ref, bo_ref, o_ref = rest     # bones = block-diag ones (D, D)
    else:
        (o_ref,) = rest

    factor = scale ** (-0.25)
    Bt, N = batch_tile, seq_len
    D = x_ref.shape[-1]

    # In-kernel bf16 cast (VPU op hidden under the MXU); x arrives as f32.
    x = x_ref[...].reshape(Bt * N, D).astype(jnp.bfloat16)          # (Bt*N, D)

    # Fused full-D projections: one lane-dense bf16 MXU matmul each, f32 accum.
    # (The module's `key` Linear is dead code and is intentionally not computed.)
    q_all = jnp.dot(x, wq_ref[...], preferred_element_type=jnp.float32) + bq_ref[...]
    v_all = jnp.dot(x, wv_ref[...], preferred_element_type=jnp.float32) + bv_ref[...]

    # ---- q = softmax(q, dim=-1) * scale**-0.25  (softmax over each head's
    #      d_head-wide column segment), done on the WHOLE slab -----------------
    # Row-global max is an exact stabilizer for every segment (softmax is shift
    # invariant per segment); per-segment sums come from ONE full-width matmul
    # with the block-diagonal ones matrix (== S @ S^T) -> no per-head slices.
    row_max = jnp.max(q_all, axis=-1, keepdims=True)
    e = jnp.exp(q_all - row_max)                                    # (Bt*N, D) f32
    if n_heads > 1:
        seg_sum = jnp.dot(e.astype(jnp.bfloat16), bones_ref[...],
                          preferred_element_type=jnp.float32)       # per-head sums,
    else:                                                           # broadcast per col
        seg_sum = jnp.sum(e, axis=-1, keepdims=True)
    q = e * pl.reciprocal(seg_sum, approx=True) * factor            # module's q

    v_bf = v_all.astype(jnp.bfloat16)

    # Small static loop over the packed batch elements.  (The token softmax,
    # ek^T v and the final matmul are inherently per batch element; unlike the
    # old per-head loop, every iteration is full-lane-width (N,D)/(D,D) work.)
    for b in range(Bt):
        rows = slice(b * N, (b + 1) * N)
        q_b = q[rows, :]                                            # (N, D) f32

        # ---- k = softmax(q, dim=-2) * scale**-0.25  (token axis, per column) --
        col_max = jnp.max(q_b, axis=0, keepdims=True)               # (1, D)
        ek = jnp.exp(q_b - col_max)                                 # (N, D)
        col_sum = jnp.sum(ek, axis=0, keepdims=True)                # (1, D)
        # k = ek * (factor / col_sum).  Fold that column normalization into q's
        # columns instead of materializing k:
        #   attn = q @ (k^T v)  ==  (q * factor/col_sum) @ (ek^T v)
        # Exact f32 divide (one per column) per the correctness review note.
        q_eff = (q_b * (factor / col_sum)).astype(jnp.bfloat16)     # (N, D)

        # G_raw = ek^T v, contracting the token axis directly (no vxpose).
        graw = lax.dot_general(ek.astype(jnp.bfloat16), v_bf[rows, :],
                               dimension_numbers=(((0,), (0,)), ((), ())),
                               preferred_element_type=jnp.float32)  # (D, D)

        if n_heads > 1:
            # Keep only the per-head diagonal (dh x dh) blocks, then fold the
            # out-projection into the tiny (D,D)x(D,D) matmul so the only
            # remaining N-sized matmul is q_eff @ m_fold.
            g = (graw * bones_ref[...]).astype(jnp.bfloat16)
            m_fold = jnp.dot(g, wo_ref[...],
                             preferred_element_type=jnp.float32)    # (D, D)
            out_b = jnp.dot(q_eff, m_fold.astype(jnp.bfloat16),
                            preferred_element_type=jnp.float32) + bo_ref[...]
        else:
            # n_heads == 1 -> no masking needed, to_out is Identity.
            out_b = jnp.dot(q_eff, graw.astype(jnp.bfloat16),
                            preferred_element_type=jnp.float32)

        o_ref[b] = out_b.astype(o_ref.dtype)                        # bf16 store, width D


# --------------------------------------------------------------------------- #
# Host-side helpers
# --------------------------------------------------------------------------- #
def prepare_params(params, n_heads):
    """One-time weight re-layout (hoisted out of the per-call forward)."""
    Wq = jnp.asarray(params["Wq"], jnp.float32)
    D = Wq.shape[0]
    assert D % n_heads == 0
    prepped = {
        "WqT": Wq.T.astype(jnp.bfloat16),                                   # (D, D)
        "bq": jnp.asarray(params["bq"], jnp.float32).reshape(1, D),
        "WvT": jnp.asarray(params["Wv"], jnp.float32).T.astype(jnp.bfloat16),
        "bv": jnp.asarray(params["bv"], jnp.float32).reshape(1, D),
    }
    if n_heads > 1:
        dh = D // n_heads
        head_id = jnp.arange(D) // dh
        # Block-diagonal ones: used both for the per-head segment-sum matmul and
        # as the (dh x dh) block-diagonal mask on G.  Exact in bf16 (values 0/1).
        prepped["Bones"] = (head_id[:, None] == head_id[None, :]).astype(jnp.bfloat16)
        prepped["WoT"] = jnp.asarray(params["Wo"], jnp.float32).T.astype(jnp.bfloat16)
        prepped["bo"] = jnp.asarray(params["bo"], jnp.float32).reshape(1, D)
    return prepped


def _choose_batch_tile(B, N, D):
    """Pack batch elements per grid step so the projection matmuls see >= ~256
    MXU rows, while keeping >= 2 grid steps when B >= 2 (feeds both v7x TCs)."""
    limit = B if B < 2 else max(1, B // 2)            # guarantee >= 2 grid steps
    rows_cap = max(N, (1 << 20) // max(D, 1))         # keep f32 slabs ~<= 4 MiB each
    best = 1
    for d in range(1, limit + 1):
        if B % d:
            continue
        if d > 1 and d * N > rows_cap:
            break
        best = d
        if d * N >= 256:
            break
    return best


_VMEM_CAP = None


def _vmem_cap_bytes():
    """Physical-VMEM-derived cap: ~56 MiB on v7x (64 MiB phys), ~112 MiB on v5e/v6e."""
    global _VMEM_CAP
    if _VMEM_CAP is None:
        try:
            phys = int(pltpu.get_tpu_info().vmem_capacity_bytes)
        except Exception:
            phys = 64 << 20                           # conservative (v7x-sized) fallback
        _VMEM_CAP = max(32 << 20, phys - max(8 << 20, phys // 8))
    return _VMEM_CAP


def _vmem_limit_bytes(Bt, N, D, n_heads):
    rows = Bt * N
    x_blk = 2 * rows * D * 4                          # f32 x block, double-buffered
    o_blk = 2 * rows * D * 2                          # bf16 out block, double-buffered
    n_w = 2 + (2 if n_heads > 1 else 0)               # WqT, WvT (+ Bones, WoT)
    w = 2 * n_w * D * D * 2                           # bf16 weights, DOUBLE-buffered
    n_b = 2 + (1 if n_heads > 1 else 0)
    b = 2 * n_b * 8 * max(D, 128) * 4                 # biases incl (8,128) padding
    scratch = 10 * rows * D * 4 + 4 * D * D * 4       # in-kernel temporaries
    budget = x_blk + o_blk + w + b + scratch + (4 << 20)
    return int(min(max(budget, 32 << 20), _vmem_cap_bytes()))


@functools.partial(jax.jit, static_argnames=("n_heads",))
def efficient_self_attention(x, prepped, *, n_heads):
    """x: (B, N, D) float32 (or bf16).  Returns (B, N, D) bfloat16."""
    B, N, D = x.shape
    assert D % n_heads == 0
    dh = D // n_heads
    scale = float(dh) ** 0.5
    multi = n_heads > 1
    Bt = _choose_batch_tile(B, N, D)

    kernel = functools.partial(_esa_kernel, n_heads=n_heads, scale=scale,
                               batch_tile=Bt, seq_len=N)

    in_specs = [
        pl.BlockSpec((Bt, N, D), lambda b: (b, 0, 0)),   # x (f32, cast in-kernel)
        pl.BlockSpec((D, D), lambda b: (0, 0)),          # Wq^T
        pl.BlockSpec((1, D), lambda b: (0, 0)),          # bq
        pl.BlockSpec((D, D), lambda b: (0, 0)),          # Wv^T
        pl.BlockSpec((1, D), lambda b: (0, 0)),          # bv
    ]
    args = [x, prepped["WqT"], prepped["bq"], prepped["WvT"], prepped["bv"]]
    if multi:
        in_specs += [
            pl.BlockSpec((D, D), lambda b: (0, 0)),      # block-diagonal ones / mask
            pl.BlockSpec((D, D), lambda b: (0, 0)),      # Wo^T
            pl.BlockSpec((1, D), lambda b: (0, 0)),      # bo
        ]
        args += [prepped["Bones"], prepped["WoT"], prepped["bo"]]

    return pl.pallas_call(
        kernel,
        out_shape=jax.ShapeDtypeStruct((B, N, D), jnp.bfloat16),   # bf16, natural width
        grid=(B // Bt,),
        in_specs=in_specs,
        out_specs=pl.BlockSpec((Bt, N, D), lambda b: (b, 0, 0)),
        compiler_params=pltpu.CompilerParams(
            dimension_semantics=("parallel",),
            vmem_limit_bytes=_vmem_limit_bytes(Bt, N, D, n_heads)),
    )(*args)


# --------------------------------------------------------------------------- #
# Reference & self-test
# --------------------------------------------------------------------------- #
def reference(x, params, n_heads):
    """Pure-JAX f32 mirror of the PyTorch forward (inference mode)."""
    B, N, D = x.shape
    dh = D // n_heads
    scale = float(dh) ** 0.5
    q = x @ params["Wq"].T + params["bq"]
    v = x @ params["Wv"].T + params["bv"]
    q = q.reshape(B, N, n_heads, dh).transpose(0, 2, 1, 3)
    v = v.reshape(B, N, n_heads, dh).transpose(0, 2, 1, 3)
    q = jax.nn.softmax(q, axis=-1) * scale ** (-0.25)
    k = jax.nn.softmax(q, axis=-2) * scale ** (-0.25)        # reproduces module quirk
    ctx = jnp.einsum("bhnd,bhne->bhde", k, v)
    attn = jnp.einsum("bhnd,bhde->bhne", q, ctx)
    attn = attn.transpose(0, 2, 1, 3).reshape(B, N, D)
    if n_heads > 1:
        attn = attn @ params["Wo"].T + params["bo"]
    return attn


if __name__ == "__main__":
    B, N, D, H = 2, 8, 32, 4          # batch, seq, d_hidden, n_heads
    key = jax.random.PRNGKey(0)
    kx, *kp = jax.random.split(key, 9)
    s = 1.0 / (D ** 0.5)
    params = {
        "Wq": jax.random.uniform(kp[0], (D, D), jnp.float32, -s, s),
        "bq": jax.random.uniform(kp[1], (D,), jnp.float32, -s, s),
        "Wk": jax.random.uniform(kp[2], (D, D), jnp.float32, -s, s),  # dead code in module
        "bk": jax.random.uniform(kp[3], (D,), jnp.float32, -s, s),    # dead code in module
        "Wv": jax.random.uniform(kp[4], (D, D), jnp.float32, -s, s),
        "bv": jax.random.uniform(kp[5], (D,), jnp.float32, -s, s),
        "Wo": jax.random.uniform(kp[6], (D, D), jnp.float32, -s, s),
        "bo": jax.random.uniform(kp[7], (D,), jnp.float32, -s, s),
    }
    x = jax.random.normal(kx, (B, N, D), jnp.float32)

    # Multi-head path (to_out Linear, folded into the kernel).
    prepped = prepare_params(params, n_heads=H)
    out = jax.block_until_ready(efficient_self_attention(x, prepped, n_heads=H))
    ref = reference(x, params, H)
    assert out.shape == (B, N, D)
    err = float(jnp.max(jnp.abs(out.astype(jnp.float32) - ref)))
    # bf16 matmul operands / bf16 output / approx head-softmax reciprocal.
    assert jnp.allclose(out.astype(jnp.float32), ref, atol=5e-2, rtol=5e-2), \
        f"max abs err = {err}"

    # Single-head path (to_out is Identity; no Wo/bo/mask shipped to the kernel).
    prepped1 = prepare_params(params, n_heads=1)
    out1 = jax.block_until_ready(efficient_self_attention(x, prepped1, n_heads=1))
    ref1 = reference(x, params, 1)
    assert out1.shape == (B, N, D)
    err1 = float(jnp.max(jnp.abs(out1.astype(jnp.float32) - ref1)))
    assert jnp.allclose(out1.astype(jnp.float32), ref1, atol=5e-2, rtol=5e-2), \
        f"max abs err = {err1}"

    print("KERNEL_OK")
</pallas_src>

<mosaic_0001>
module attributes {stable_mosaic.version = 11 : i64} {
  func.func @_esa_kernel(%arg0: i32, %arg1: memref<1x8x32xf32, #tpu.memory_space<vmem>>, %arg2: memref<32x32xbf16, #tpu.memory_space<vmem>>, %arg3: memref<1x32xf32, #tpu.memory_space<vmem>>, %arg4: memref<32x32xbf16, #tpu.memory_space<vmem>>, %arg5: memref<1x32xf32, #tpu.memory_space<vmem>>, %arg6: memref<32x32xbf16, #tpu.memory_space<vmem>>, %arg7: memref<32x32xbf16, #tpu.memory_space<vmem>>, %arg8: memref<1x32xf32, #tpu.memory_space<vmem>>, %arg9: memref<1x8x32xbf16, #tpu.memory_space<vmem>>) attributes {dimension_semantics = [#tpu.dimension_semantics<parallel>], iteration_bounds = array<i64: 2>, scalar_prefetch = 0 : i64, scratch_operands = 0 : i64, tpu.core_type = #tpu.core_type<tc>, window_params = [{transform_indices = @transform_0, window_bounds = array<i64: 1, 8, 32>}, {pipeline_mode = #tpu.pipeline_mode<synchronous>, transform_indices = @transform_1, window_bounds = array<i64: 32, 32>}, {pipeline_mode = #tpu.pipeline_mode<synchronous>, transform_indices = @transform_2, window_bounds = array<i64: 1, 32>}, {pipeline_mode = #tpu.pipeline_mode<synchronous>, transform_indices = @transform_3, window_bounds = array<i64: 32, 32>}, {pipeline_mode = #tpu.pipeline_mode<synchronous>, transform_indices = @transform_4, window_bounds = array<i64: 1, 32>}, {pipeline_mode = #tpu.pipeline_mode<synchronous>, transform_indices = @transform_5, window_bounds = array<i64: 32, 32>}, {pipeline_mode = #tpu.pipeline_mode<synchronous>, transform_indices = @transform_6, window_bounds = array<i64: 32, 32>}, {pipeline_mode = #tpu.pipeline_mode<synchronous>, transform_indices = @transform_7, window_bounds = array<i64: 1, 32>}, {transform_indices = @transform_8, window_bounds = array<i64: 1, 8, 32>}]} {
    %c0 = arith.constant 0 : index
    %c0_0 = arith.constant 0 : index
    %c0_1 = arith.constant 0 : index
    %0 = vector.load %arg1[%c0, %c0_0, %c0_1] : memref<1x8x32xf32, #tpu.memory_space<vmem>>, vector<1x8x32xf32>
    %1 = vector.shape_cast %0 : vector<1x8x32xf32> to vector<8x32xf32>
    %2 = arith.truncf %1 : vector<8x32xf32> to vector<8x32xbf16>
    %c0_2 = arith.constant 0 : index
    %c0_3 = arith.constant 0 : index
    %3 = vector.load %arg2[%c0_2, %c0_3] : memref<32x32xbf16, #tpu.memory_space<vmem>>, vector<32x32xbf16>
    %cst = arith.constant dense<0.000000e+00> : vector<8x32xf32>
    %4 = tpu.matmul %2, %3, %cst {dimension_numbers = #tpu.dot_dimension_numbers<[1], [0], [0], [1], [0, 0, 1, 1], [], []>} : vector<8x32xbf16>, vector<32x32xbf16>, vector<8x32xf32> -> vector<8x32xf32>
    %c0_4 = arith.constant 0 : index
    %c0_5 = arith.constant 0 : index
    %5 = vector.load %arg3[%c0_4, %c0_5] : memref<1x32xf32, #tpu.memory_space<vmem>>, vector<1x32xf32>
    %6 = vector.broadcast %5 : vector<1x32xf32> to vector<8x32xf32>
    %7 = arith.addf %4, %6 : vector<8x32xf32>
    %c0_6 = arith.constant 0 : index
    %c0_7 = arith.constant 0 : index
    %8 = vector.load %arg4[%c0_6, %c0_7] : memref<32x32xbf16, #tpu.memory_space<vmem>>, vector<32x32xbf16>
    %cst_8 = arith.constant dense<0.000000e+00> : vector<8x32xf32>
    %9 = tpu.matmul %2, %8, %cst_8 {dimension_numbers = #tpu.dot_dimension_numbers<[1], [0], [0], [1], [0, 0, 1, 1], [], []>} : vector<8x32xbf16>, vector<32x32xbf16>, vector<8x32xf32> -> vector<8x32xf32>
    %c0_9 = arith.constant 0 : index
    %c0_10 = arith.constant 0 : index
    %10 = vector.load %arg5[%c0_9, %c0_10] : memref<1x32xf32, #tpu.memory_space<vmem>>, vector<1x32xf32>
    %11 = vector.broadcast %10 : vector<1x32xf32> to vector<8x32xf32>
    %12 = arith.addf %9, %11 : vector<8x32xf32>
    %cst_11 = arith.constant dense<0xFF800000> : vector<8xf32>
    %13 = vector.multi_reduction <maximumf>, %7, %cst_11 [1] : vector<8x32xf32> to vector<8xf32>
    %14 = vector.shape_cast %13 : vector<8xf32> to vector<8x1xf32>
    %15 = vector.broadcast %14 : vector<8x1xf32> to vector<8x32xf32>
    %16 = arith.subf %7, %15 : vector<8x32xf32>
    %17 = math.exp %16 : vector<8x32xf32>
    %18 = arith.truncf %17 : vector<8x32xf32> to vector<8x32xbf16>
    %c0_12 = arith.constant 0 : index
    %c0_13 = arith.constant 0 : index
    %19 = vector.load %arg6[%c0_12, %c0_13] : memref<32x32xbf16, #tpu.memory_space<vmem>>, vector<32x32xbf16>
    %cst_14 = arith.constant dense<0.000000e+00> : vector<8x32xf32>
    %20 = tpu.matmul %18, %19, %cst_14 {dimension_numbers = #tpu.dot_dimension_numbers<[1], [0], [0], [1], [0, 0, 1, 1], [], []>} : vector<8x32xbf16>, vector<32x32xbf16>, vector<8x32xf32> -> vector<8x32xf32>
    %21 = tpu.reciprocal %20 {approx = true} : vector<8x32xf32> -> vector<8x32xf32>
    %22 = arith.mulf %17, %21 : vector<8x32xf32>
    %cst_15 = arith.constant 0.771105408 : f32
    %23 = vector.broadcast %cst_15 : f32 to vector<8x32xf32>
    %24 = arith.mulf %22, %23 : vector<8x32xf32>
    %25 = arith.truncf %12 : vector<8x32xf32> to vector<8x32xbf16>
    %cst_16 = arith.constant dense<0xFF800000> : vector<32xf32>
    %26 = vector.multi_reduction <maximumf>, %24, %cst_16 [0] : vector<8x32xf32> to vector<32xf32>
    %27 = vector.shape_cast %26 : vector<32xf32> to vector<1x32xf32>
    %28 = vector.broadcast %27 : vector<1x32xf32> to vector<8x32xf32>
    %29 = arith.subf %24, %28 : vector<8x32xf32>
    %30 = math.exp %29 : vector<8x32xf32>
    %cst_17 = arith.constant dense<0.000000e+00> : vector<32xf32>
    %31 = vector.multi_reduction <add>, %30, %cst_17 [0] : vector<8x32xf32> to vector<32xf32>
    %32 = vector.shape_cast %31 : vector<32xf32> to vector<1x32xf32>
    %cst_18 = arith.constant 0.771105408 : f32
    %33 = vector.broadcast %cst_18 : f32 to vector<1x32xf32>
    %34 = arith.divf %33, %32 : vector<1x32xf32>
    %35 = vector.broadcast %34 : vector<1x32xf32> to vector<8x32xf32>
    %36 = arith.mulf %24, %35 : vector<8x32xf32>
    %37 = arith.truncf %36 : vector<8x32xf32> to vector<8x32xbf16>
    %38 = arith.truncf %30 : vector<8x32xf32> to vector<8x32xbf16>
    %cst_19 = arith.constant dense<0.000000e+00> : vector<32x32xf32>
    %39 = tpu.matmul %38, %25, %cst_19 {dimension_numbers = #tpu.dot_dimension_numbers<[0], [0], [1], [1], [0, 1, 1, 1], [], []>} : vector<8x32xbf16>, vector<8x32xbf16>, vector<32x32xf32> -> vector<32x32xf32>
    %c0_20 = arith.constant 0 : index
    %c0_21 = arith.constant 0 : index
    %40 = vector.load %arg6[%c0_20, %c0_21] : memref<32x32xbf16, #tpu.memory_space<vmem>>, vector<32x32xbf16>
    %41 = arith.extf %40 : vector<32x32xbf16> to vector<32x32xf32>
    %42 = arith.mulf %39, %41 : vector<32x32xf32>
    %43 = arith.truncf %42 : vector<32x32xf32> to vector<32x32xbf16>
    %c0_22 = arith.constant 0 : index
    %c0_23 = arith.constant 0 : index
    %44 = vector.load %arg7[%c0_22, %c0_23] : memref<32x32xbf16, #tpu.memory_space<vmem>>, vector<32x32xbf16>
    %cst_24 = arith.constant dense<0.000000e+00> : vector<32x32xf32>
    %45 = tpu.matmul %43, %44, %cst_24 {dimension_numbers = #tpu.dot_dimension_numbers<[1], [0], [0], [1], [0, 0, 1, 1], [], []>} : vector<32x32xbf16>, vector<32x32xbf16>, vector<32x32xf32> -> vector<32x32xf32>
    %46 = arith.truncf %45 : vector<32x32xf32> to vector<32x32xbf16>
    %cst_25 = arith.constant dense<0.000000e+00> : vector<8x32xf32>
    %47 = tpu.matmul %37, %46, %cst_25 {dimension_numbers = #tpu.dot_dimension_numbers<[1], [0], [0], [1], [0, 0, 1, 1], [], []>} : vector<8x32xbf16>, vector<32x32xbf16>, vector<8x32xf32> -> vector<8x32xf32>
    %c0_26 = arith.constant 0 : index
    %c0_27 = arith.constant 0 : index
    %48 = vector.load %arg8[%c0_26, %c0_27] : memref<1x32xf32, #tpu.memory_space<vmem>>, vector<1x32xf32>
    %49 = vector.broadcast %48 : vector<1x32xf32> to vector<8x32xf32>
    %50 = arith.addf %47, %49 : vector<8x32xf32>
    %51 = arith.truncf %50 : vector<8x32xf32> to vector<8x32xbf16>
    %c0_28 = arith.constant 0 : index
    %c0_29 = arith.constant 0 : index
    %c0_30 = arith.constant 0 : index
    %52 = vector.load %arg9[%c0_28, %c0_29, %c0_30] : memref<1x8x32xbf16, #tpu.memory_space<vmem>>, vector<1x8x32xbf16>
    %53 = vector.shape_cast %52 : vector<1x8x32xbf16> to vector<8x32xbf16>
    %54 = vector.shape_cast %51 : vector<8x32xbf16> to vector<1x8x32xbf16>
    tpu.vector_store %arg9[%c0_28, %c0_29, %c0_30], %54 {strides = array<i32>} : memref<1x8x32xbf16, #tpu.memory_space<vmem>>, vector<1x8x32xbf16>,
    return
  }
  func.func @transform_0(%arg0: i32) -> (i32, i32, i32) {
    %c0_i32 = arith.constant 0 : i32
    %c0_i32_0 = arith.constant 0 : i32
    %c0_i32_1 = arith.constant 0 : i32
    return %arg0, %c0_i32, %c0_i32_0 : i32, i32, i32
  }
  func.func @transform_1(%arg0: i32) -> (i32, i32) {
    %c0_i32 = arith.constant 0 : i32
    %c0_i32_0 = arith.constant 0 : i32
    %c0_i32_1 = arith.constant 0 : i32
    return %c0_i32, %c0_i32_0 : i32, i32
  }
  func.func @transform_2(%arg0: i32) -> (i32, i32) {
    %c0_i32 = arith.constant 0 : i32
    %c0_i32_0 = arith.constant 0 : i32
    %c0_i32_1 = arith.constant 0 : i32
    return %c0_i32, %c0_i32_0 : i32, i32
  }
  func.func @transform_3(%arg0: i32) -> (i32, i32) {
    %c0_i32 = arith.constant 0 : i32
    %c0_i32_0 = arith.constant 0 : i32
    %c0_i32_1 = arith.constant 0 : i32
    return %c0_i32, %c0_i32_0 : i32, i32
  }
  func.func @transform_4(%arg0: i32) -> (i32, i32) {
    %c0_i32 = arith.constant 0 : i32
    %c0_i32_0 = arith.constant 0 : i32
    %c0_i32_1 = arith.constant 0 : i32
    return %c0_i32, %c0_i32_0 : i32, i32
  }
  func.func @transform_5(%arg0: i32) -> (i32, i32) {
    %c0_i32 = arith.constant 0 : i32
    %c0_i32_0 = arith.constant 0 : i32
    %c0_i32_1 = arith.constant 0 : i32
    return %c0_i32, %c0_i32_0 : i32, i32
  }
  func.func @transform_6(%arg0: i32) -> (i32, i32) {
    %c0_i32 = arith.constant 0 : i32
    %c0_i32_0 = arith.constant 0 : i32
    %c0_i32_1 = arith.constant 0 : i32
    return %c0_i32, %c0_i32_0 : i32, i32
  }
  func.func @transform_7(%arg0: i32) -> (i32, i32) {
    %c0_i32 = arith.constant 0 : i32
    %c0_i32_0 = arith.constant 0 : i32
    %c0_i32_1 = arith.constant 0 : i32
    return %c0_i32, %c0_i32_0 : i32, i32
  }
  func.func @transform_8(%arg0: i32) -> (i32, i32, i32) {
    %c0_i32 = arith.constant 0 : i32
    %c0_i32_0 = arith.constant 0 : i32
    %c0_i32_1 = arith.constant 0 : i32
    return %arg0, %c0_i32, %c0_i32_0 : i32, i32, i32
  }
}

</mosaic_0001>

<bundles_post_ra>
// kernel: efficient_self_attention.1
= control target key start
LH: loop header
LB: loop body
LE: loop exit
PB: predicated region body
PF: predicated region fallthrough
CT: control target
= control target key end

     0   :  { %s1763_s0 = inlined_call_operand.hbm [shape: f32[2,8,32], index: 0, kind: input, shape index: {}]   ;;  %s1764_s1 = inlined_call_operand.hbm [shape: bf16[32,32], index: 1, kind: input, shape index: {}]   ;;  %s1765_s2 = inlined_call_operand.vmem [shape: f32[1,32], index: 2, kind: input, shape index: {}]   ;;  %s1766_s3 = inlined_call_operand.hbm [shape: bf16[32,32], index: 3, kind: input, shape index: {}]   ;;  %s1767_s4 = inlined_call_operand.vmem [shape: f32[1,32], index: 4, kind: input, shape index: {}]   ;;  %s1768_s5 = inlined_call_operand.hbm [shape: bf16[32,32], index: 5, kind: input, shape index: {}]   ;;  %s1769_s6 = inlined_call_operand.hbm [shape: bf16[32,32], index: 6, kind: input, shape index: {}]   ;;  %s1770_s7 = inlined_call_operand.vmem [shape: f32[1,32], index: 7, kind: input, shape index: {}]   ;;  %s1771_s8 = inlined_call_operand.hbm [shape: bf16[2,8,32], index: 8, kind: output, shape index: {}]  }
   0x1   :  { %1775 = sst [smem:[#allocation16_spill]] %s1764_s1 }
   0x2   :  { %13 = vsyncpa [#allocation3], 0 }
   0x3   :  { %15 = vsyncpa [#allocation3 + $0x1], 0 }
   0x4   :  { %16 = vsyncpa [#allocation6], 0 }
   0x5   :  { %17 = vsyncpa [#allocation9], 0 }
   0x6   :  { %18 = vsyncpa [#allocation4], 0 }
   0x7   :  { %20 = vsyncpa [#allocation4 + $0x1], 0  ;;  %s1426_s27 = smov 0   ;;  %s1428_s28 = smov 0  }
   0x8   :  { %s1430_s29 = smov 0   ;;  %s1432_s30 = smov 0  }
   0x9 LB: > { %s1371_s9 = smov [#allocation5]   ;;  %s1447_s11 = sadd.s32 4294967295, %s1369_s30   ;;  %s1369_s30 = sphi %s1432_s30, %s1797_s30   ;;  %s1365_s29 = sphi %s1430_s29, %s1796_s29   ;;  %s1361_s28 = sphi %s1428_s28, %s1795_s28   ;;  %s1357_s27 = sphi %s1426_s27, %s1794_s27  }
   0xa   : > { %s242_s10 = sshll.u32 %s1371_s9, 4  ;;  %p939_p0 = scmp.ge.s32.totalorder %s1369_s30, 1  ;;  %s1452_s10 = int_to_ptr.vmem [resolvable:$true] %s242_s10 }
   0xb   : > { %p1772_p1 = scmp.eq.s32.totalorder %s1447_s11, 0  ;;  %p230_p2 = scmp.lt.s32.totalorder %s1369_s30, 3 }
   0xc   : > { %s1372_s13 = smov [#allocation8]   ;;  %s1373_s16 = smov [#allocation7]  }
   0xd   : > { %p1454_p3 = pnand %p939_p0, %p230_p2  ;;  %s274_s14 = sshll.u32 %s1372_s13, 4  ;;  %s1467_s14 = int_to_ptr.vmem [resolvable:$true] %s274_s14 }
   0xe   : > { %s258_s17 = sshll.u32 %s1373_s16, 4  ;;  %s1778_s1 = sld [smem:[#allocation16_spill]]  ;;  %s1469_s17 = int_to_ptr.vmem [resolvable:$true] %s258_s17 }
   0xf   : > { %s1776_s12 = scalar_select %p1454_p3, 1, 0 }
  0x10   : > { %p1063_p5 = pneg %p1454_p3 }
  0x12   : > { %p1463_p6 = pnand %p1063_p5, %p1772_p1 }
  0x14   : > { %s1153_s20 = scalar_lea.hbm %s1778_s1, 256  ;;  %p1479_p8 = pneg %p1463_p6 }
  0x15   : > { %p1154_p7 = scmp.ne.s32.totalorder %s1778_s1, %s1153_s20  ;;  %p1160_p11 = scmp.lt.u32.totalorder %s1153_s20, %s1778_s1 }
  0x17   : > { %p1156_p9 = pnand %p1479_p8, %p1154_p7 }
  0x19   : > { %p1157_p10 = pneg %p1156_p9 }
  0x1b   : > { %p1162_p12 = pnand %p1160_p11, %p1157_p10 }
  0x1d   : > { %1165 = shalt.err (!%p1162_p12)
}
  0x1e   : > { %s1166_s26 = scalar_lea.vmem %s1452_s10, 256  ;;  %p1174_p5 = scmp.lt.s32.totalorder %s1452_s10, %s1452_s10 }
  0x1f   : > { %p1167_p13 = scmp.ne.s32.totalorder %s1452_s10, %s1166_s26  ;;  %p1175_p4 = scmp.lt.s32.totalorder %s1166_s26, %s1166_s26 }
  0x21   : > { %p1169_p0 = pnand %p1167_p13, %p1479_p8  ;;  %p1176_p7 = por %p1175_p4, %p1174_p5 }
  0x23   : > { %p1170_p2 = pneg %p1169_p0 }
  0x25   : > { %p1177_p9 = pnand %p1176_p7, %p1170_p2 }
  0x27   : > { %1180 = shalt.err (!%p1177_p9)
}
  0x28   : > { %s1374_s9 = smov 64   ;;  %s1375_s13 = smov 4  }
  0x29   : > { %1066 = dma.hbm_to_vmem [thread:$0]  (!%p1463_p6), %s1778_s1, 256, %s1452_s10, [#allocation6], %s1374_s9, %s1374_s9, %s1375_s13  }
  0x2a   : > { %s1181_s21 = scalar_lea.hbm %s1768_s5, 256 }
  0x2b   : > { %p1182_p4 = scmp.ne.s32.totalorder %s1768_s5, %s1181_s21  ;;  %p1188_p12 = scmp.lt.u32.totalorder %s1181_s21, %s1768_s5 }
  0x2d   : > { %p1184_p10 = pnand %p1182_p4, %p1479_p8 }
  0x2f   : > { %p1185_p11 = pneg %p1184_p10 }
  0x31   : > { %p1190_p13 = pnand %p1188_p12, %p1185_p11 }
  0x33   : > { %1193 = shalt.err (!%p1190_p13)
}
  0x34   : > { %s1194_s10 = scalar_lea.vmem %s1467_s14, 256  ;;  %p1202_p7 = scmp.lt.s32.totalorder %s1467_s14, %s1467_s14 }
  0x35   : > { %p1195_p0 = scmp.ne.s32.totalorder %s1467_s14, %s1194_s10  ;;  %p1203_p9 = scmp.lt.s32.totalorder %s1194_s10, %s1194_s10 }
  0x37   : > { %p1197_p2 = pnand %p1195_p0, %p1479_p8  ;;  %p1204_p4 = por %p1203_p9, %p1202_p7 }
  0x39   : > { %p1198_p5 = pneg %p1197_p2 }
  0x3b   : > { %p1205_p10 = pnand %p1204_p4, %p1198_p5 }
  0x3d   : > { %1208 = shalt.err (!%p1205_p10)
}
  0x3e   : > { %1072 = dma.hbm_to_vmem [thread:$0]  (!%p1463_p6), %s1768_s5, 256, %s1467_s14, [#allocation9], %s1374_s9, %s1374_s9, %s1375_s13  }
  0x3f   : > { %s1209_s21 = scalar_lea.hbm %s1766_s3, 256 }
  0x40   : > { %p1210_p11 = scmp.ne.s32.totalorder %s1766_s3, %s1209_s21  ;;  %p1216_p0 = scmp.lt.u32.totalorder %s1209_s21, %s1766_s3 }
  0x42   : > { %p1212_p12 = pnand %p1210_p11, %p1479_p8 }
  0x44   : > { %p1213_p13 = pneg %p1212_p12 }
  0x46   : > { %p1218_p2 = pnand %p1216_p0, %p1213_p13 }
  0x48   : > { %1221 = shalt.err (!%p1218_p2)
}
  0x49   : > { %s1222_s14 = scalar_lea.vmem %s1469_s17, 256  ;;  %p1230_p4 = scmp.lt.s32.totalorder %s1469_s17, %s1469_s17 }
  0x4a   : > { %p1223_p5 = scmp.ne.s32.totalorder %s1469_s17, %s1222_s14  ;;  %p1231_p10 = scmp.lt.s32.totalorder %s1222_s14, %s1222_s14 }
  0x4c   : > { %p1225_p7 = pnand %p1223_p5, %p1479_p8  ;;  %p1232_p11 = por %p1231_p10, %p1230_p4 }
  0x4e   : > { %p1226_p9 = pneg %p1225_p7 }
  0x50   : > { %p1233_p12 = pnand %p1232_p11, %p1226_p9 }
  0x52   : > { %1236 = shalt.err (!%p1233_p12)
}
  0x53   : > { %1069 = dma.hbm_to_vmem [thread:$0]  (!%p1463_p6), %s1766_s3, 256, %s1469_s17, [#allocation6], %s1374_s9, %s1374_s9, %s1375_s13  }
  0x54   : > { %s1376_s18 = smov [#allocation10]   ;;  %s1237_s22 = scalar_lea.hbm %s1769_s6, 256 }
  0x55   : > { %s287_s19 = sshll.u32 %s1376_s18, 4  ;;  %p1238_p13 = scmp.ne.s32.totalorder %s1769_s6, %s1237_s22  ;;  %s288_s19 = int_to_ptr.vmem [resolvable:$true] %s287_s19 }
  0x56   : > { %p1244_p5 = scmp.lt.u32.totalorder %s1237_s22, %s1769_s6 }
  0x57   : > { %p1240_p0 = pnand %p1238_p13, %p1479_p8 }
  0x59   : > { %p1241_p2 = pneg %p1240_p0 }
  0x5b   : > { %p1246_p7 = pnand %p1244_p5, %p1241_p2 }
  0x5d   : > { %1249 = shalt.err (!%p1246_p7)
}
  0x5e   : > { %s1250_s17 = scalar_lea.vmem %s288_s19, 256  ;;  %p1258_p11 = scmp.lt.s32.totalorder %s288_s19, %s288_s19 }
  0x5f   : > { %p1251_p9 = scmp.ne.s32.totalorder %s288_s19, %s1250_s17  ;;  %p1259_p12 = scmp.lt.s32.totalorder %s1250_s17, %s1250_s17 }
  0x61   : > { %p1253_p4 = pnand %p1251_p9, %p1479_p8  ;;  %p1260_p1 = por %p1259_p12, %p1258_p11 }
  0x63   : > { %p1254_p10 = pneg %p1253_p4 }
  0x65   : > { %p1261_p3 = pnand %p1260_p1, %p1254_p10 }
  0x67   : > { %1264 = shalt.err (!%p1261_p3)
}
  0x68   : > { %1075 = dma.hbm_to_vmem [thread:$0]  (!%p1463_p6), %s1769_s6, 256, %s288_s19, [#allocation9], %s1374_s9, %s1374_s9, %s1375_s13  }
  0x69   : > { %s938_s15 = sadd.s32 4294967294, %s1369_s30   ;;  %s1578_s23 = sadd.s32 1, %s1369_s30  }
  0x6a   : > { %s30_s18 = ssub.s32 %s1369_s30, %s1578_s23  ;;  %s33_s20 = sadd.s32 1, %s1365_s29 }
  0x6b   : > { %p31_p1 = scmp.eq.s32.totalorder %s30_s18, 0  ;;  %p40_p3 = scmp.ne.s32.totalorder %s1365_s29, %s1361_s28 }
  0x6c   : > { %p41_p8 = scmp.eq.s32.totalorder %s1369_s30, 0  ;;  %p46_p13 = scmp.ne.s32.totalorder %s1361_s28, %s1357_s27 }
  0x6d   : > { %s1589_s21 = scalar_select %p31_p1, %s1365_s29, %s33_s20  }
  0x6e   : > { %p1591_p0 = por %p41_p8, %p40_p3  ;;  %p1781_p2 = scmp.eq.s32.totalorder %s1447_s11, 0 }
  0x6f   : > { %p217_p5 = scmp.eq.s32.totalorder %s1447_s11, 1  ;;  %p223_p7 = scmp.eq.s32.totalorder %s938_s15, 1 }
  0x70   : > { %p1597_p6 = por %p1781_p2, %p46_p13  ;;  %p1088_p9 = scmp.lt.s32.totalorder %s1369_s30, 2 }
  0x71   : > { %s304_s13 = sand.u32 1, %s1365_s29   ;;  %p1604_p4 = por %p217_p5, %p40_p3 }
  0x72   : > { %p1608_p10 = por %p223_p7, %p46_p13  ;;  %s945_s25 = sshll.u32 %s304_s13, 3 }
  0x73   : > { %s1783_s19 = scalar_select %p1604_p4, 1, 0 }
  0x74   : > { %s1784_s24 = scalar_select %p1608_p10, 1, 0 }
  0x75   : > { %s946_s26 = sshll.u32 %s1369_s30, 7  ;;  %s308_s16 = scalar_lea.vmem [#allocation2], %s945_s25 }
  0x76   : > { %s1616_s10 = scalar_lea.hbm %s1763_s0, %s946_s26  ;;  %s315_s15 = sshll.u32 %s308_s16, 4  ;;  %s1618_s15 = int_to_ptr.vmem [resolvable:$true] %s315_s15 }
  0x77   : > { %p1622_p11 = pnand %p1088_p9, %p1591_p0  ;;  %s305_s20 = scalar_lea.sflag [#allocation3], %s304_s13 }
  0x78   : > { %s1265_s1 = scalar_lea.hbm %s1616_s10, 128  ;;  %s1270_s14 = scalar_lea.hbm %s1763_s0, 256 }
  0x79   : > { %p1266_p12 = scmp.ne.s32.totalorder %s1616_s10, %s1265_s1  ;;  %p1267_p1 = pneg %p1622_p11 }
  0x7a   : > { %p1271_p13 = scmp.lt.u32.totalorder %s1616_s10, %s1763_s0  ;;  %p1272_p0 = scmp.lt.u32.totalorder %s1270_s14, %s1265_s1 }
  0x7b   : > { %p1268_p3 = pnand %p1267_p1, %p1266_p12  ;;  %p1274_p5 = scmp.lt.u32.totalorder %s1265_s1, %s1616_s10 }
  0x7c   : > { %p1273_p2 = por %p1272_p0, %p1271_p13 }
  0x7d   : > { %p1269_p8 = pneg %p1268_p3 }
  0x7e   : > { %p1275_p7 = por %p1274_p5, %p1273_p2 }
  0x80   : > { %p1276_p9 = pnand %p1275_p7, %p1269_p8 }
  0x82   : > { %1279 = shalt.err (!%p1276_p9)
}
  0x83   : > { %s1280_s13 = scalar_lea.vmem %s1618_s15, 128  ;;  %s1377_s16 = smov [#allocation2]  }
  0x84   : > { %p1281_p12 = scmp.ne.s32.totalorder %s1618_s15, %s1280_s13  ;;  %s1285_s25 = sshll.u32 %s1377_s16, 4  ;;  %s1286_s25 = int_to_ptr.vmem [resolvable:$false] %s1285_s25 }
  0x85   : > { %s1287_s26 = scalar_lea.vmem %s1286_s25, 256  ;;  %p1288_p4 = scmp.lt.s32.totalorder %s1618_s15, %s1286_s25 }
  0x86   : > { %p1283_p3 = pnand %p1281_p12, %p1267_p1  ;;  %p1289_p13 = scmp.lt.s32.totalorder %s1287_s26, %s1280_s13 }
  0x88   : > { %p1284_p10 = pneg %p1283_p3  ;;  %p1290_p0 = por %p1289_p13, %p1288_p4 }
  0x8a   : > { %p1291_p2 = pnand %p1290_p0, %p1284_p10 }
  0x8c   : > { %1294 = shalt.err (!%p1291_p2)
}
  0x8d   : > { %1079 = dma.hbm_to_vmem [thread:$0]  (!%p1622_p11), %s1616_s10, 128, %s1618_s15, %s305_s20  }
  0x8e   : > { %p1786_p8 = scmp.ne.s32.totalorder %s1776_s12, 0 }
  0x8f   : > { %s1654_s1 = sand.u32 (!%p1786_p8), 1, %s1361_s28  }
  0x90   : > { %324 = sbr.rel (%p1786_p8) target bundleno = 1580 (0x62c), region = 52  ;;  %s948_s14 = sshll.u32 (!%p1786_p8), %s1654_s1, 3 }
  0x91   : > { %s327_s22 = scalar_lea.sflag (!%p1786_p8), [#allocation3], %s1654_s1  ;;  %s330_s17 = scalar_lea.vmem (!%p1786_p8), [#allocation2], %s948_s14 }
  0x97   : > { %1340 = dma.done.wait (%p1597_p6), %s327_s22, 128  }
  0x98   : > { %1342 = vsyncadd (%p1597_p6), %s327_s22, 4294967168  ;;  %p1787_p4 = scmp.eq.s32.totalorder %s1447_s11, 0 }
  0x9a   : > { %1344 = dma.done.wait (%p1787_p4), [#allocation6], 512   ;;  %p1788_p10 = pmov %p1787_p4 }
  0x9b   : > { %p1789_p11 = pmov %p1787_p4 }
  0x9c   : > { %1346 = vsyncadd (%p1788_p10), [#allocation6], 4294966784 }
  0x9d   : > { %1348 = dma.done.wait (%p1789_p11), [#allocation9], 512   ;;  %p1790_p1 = pmov %p1787_p4 }
  0x9e   : > { %v1378_v0 = vmov 0.0   ;;  %vm1379_vm0 = vmmov 0   ;;  %v1135_v1 = vld [vmem:[#allocation5] sm:$0xff]   ;;  %v1136_v2 = vld [vmem:[#allocation5 + $0x8] sm:$0xff]   ;;  %v380_v3 = vld [vmem:[%s330_s17] sm:$0xff]  ;;  %vm405_vm1 = vcmask 261120  }
  0x9f   : > { %1350 = vsyncadd (%p1790_p1), [#allocation9], 4294966784  ;;  %996 = vmatprep.subr.bf16.mxu0 %v1378_v0  ;;  %1000 = vmatprep.mubr.msk.bf16.mxu0 %vm1379_vm0, %v1378_v0  ;;  %v381_v4 = vpack.c.bf16 %v380_v3, %v380_v3  ;;  %v954_v5 = vld [vmem:[%s1765_s2] ss:$0 sm:$0xff]  ;;  %v1685_v12 = vld [vmem:[#allocation8] sm:$0xff]   ;;  %vm627_vm2 = vcmask 1043456  }
  0xa0   : > { %1004 = vmatprep.subr.bf16.mxu1 %v1378_v0  ;;  %1008 = vmatprep.mubr.msk.bf16.mxu1 %vm1379_vm0, %v1378_v0  ;;  %v1687_v13 = vld [vmem:[#allocation8 + $0x8] sm:$0xff]   ;;  %v1139_v14 = vld [vmem:[#allocation7] sm:$0xff]   ;;  %v1140_v15 = vld [vmem:[#allocation7 + $0x8] sm:$0xff]   ;;  %vm620_vm3 = vcmask 64512   ;;  %s953_s18 = sshll.u32 %s1654_s1, 2  ;;  %s974_s16 = sshll.u32 %s1447_s11, 6 }
  0xa1   : > { %997 = vmatpush3.bf16.msra.mxu0 %v1135_v1  ;;  %1005 = vmatpush3.bf16.msra.mxu1 %v1139_v14  ;;  %v958_v21 = vld [vmem:[%s1767_s4] ss:$0 sm:$0xff]  ;;  %v1142_v60 = vld [vmem:[#allocation10 + $0x8] sm:$0xff]   ;;  %v682_v61 = vunpack.c.l.bf16 %v1687_v13  ;;  %v683_v62 = vunpack.c.h.bf16 %v1687_v13  ;;  %v680_v1 = vunpack.c.l.bf16 %v1685_v12  ;;  %s378_s25 = scalar_lea.vmem [#allocation11], %s953_s18  ;;  %vm814_vm4 = vcmask 257024   ;;  %s1719_s17 = scalar_lea.hbm %s1771_s8, %s974_s16 }
  0xa2   : > { %998 = vmatprep.subr.bf16.mxu0 %v1378_v0  ;;  %1006 = vmatprep.subr.bf16.mxu1 %v1378_v0  ;;  %v1141_v59 = vld [vmem:[#allocation10] sm:$0xff]   ;;  %s830_s26 = sshll.u32 %s378_s25, 4  ;;  %s817_s11 = scalar_lea.sflag [#allocation4], %s1654_s1  ;;  %s1721_s26 = int_to_ptr.vmem [resolvable:$true] %s830_s26 }
  0xa3   : > { %s1295_s12 = scalar_lea.vmem %s1721_s26, 64  ;;  %p1791_p5 = scmp.ne.s32.totalorder %s1783_s19, 0 }
  0xa4   : > { %p1296_p6 = scmp.ne.s32.totalorder %s1721_s26, %s1295_s12  ;;  %s1380_s9 = smov [#allocation11]  }
  0xa5   : > { %999 = vmatpush3.bf16.msra.mxu0 %v1136_v2  ;;  %1007 = vmatpush3.bf16.msra.mxu1 %v1140_v15  ;;  %v681_v2 = vunpack.c.h.bf16 %v1685_v12  ;;  %s1299_s10 = sshll.u32 %s1380_s9, 4  ;;  %s1300_s10 = int_to_ptr.vmem [resolvable:$false] %s1299_s10 }
  0xa6   : > { %1012 = vmatprep.subr.bf16.mxu0 %v1378_v0  ;;  %p1297_p7 = pnand %p1296_p6, %p1791_p5  ;;  %s1301_s15 = scalar_lea.vmem %s1300_s10, 128 }
  0xa7   : > { %p1302_p12 = scmp.lt.s32.totalorder %s1721_s26, %s1300_s10  ;;  %p1303_p3 = scmp.lt.s32.totalorder %s1301_s15, %s1295_s12 }
  0xa8   : > { %1001 = vmatmul.mubr.msk.bf16.vlgmr.msra.gmra.mrb[0].mxu0 %vm405_vm1, %v381_v4  ;;  %1009 = vmatmul.mubr.msk.bf16.vlgmr.msra.gmra.mrb[0].mxu1 %vm405_vm1, %v381_v4  ;;  %p1298_p9 = pneg %p1297_p7 }
  0xa9   : > { %1016 = vmatprep.mubr.msk.bf16.mxu0 %vm1379_vm0, %v1378_v0  ;;  %1013 = vmatpush3.bf16.msra.mxu0 %v1685_v12  ;;  %p1304_p13 = por %p1303_p3, %p1302_p12 }
  0xaa   : > { %1014 = vmatprep.subr.bf16.mxu0 %v1378_v0 }
  0xab   : > { %p1305_p0 = pnand %p1304_p13, %p1298_p9 }
  0xad   : > { %1015 = vmatpush3.bf16.msra.mxu0 %v1687_v13 }
  0xae   : > { %1026 = vmatprep.subr.bf16.mxu0 %v1141_v59 }
 0x17b   : > { %v443_v6 = vpop.f32.mrb[0].mxu0  ;;  %v506_v22 = vpop.f32.mrb[0].mxu1 }
 0x17c   : > { %v444_v7 = vadd.f32 %v954_v5, %v443_v6  ;;  %v1002_v8 = vpop.f32.mrb[1].mxu0  ;;  %v507_v23 = vadd.f32 %v958_v21, %v506_v22  ;;  %v1010_v24 = vpop.f32.mrb[1].mxu1 }
 0x17d   : > { %v446_v9 = vpop.f32.mrb[2].mxu0  ;;  %v509_v25 = vpop.f32.mrb[2].mxu1 }
 0x17e   : > { %v1003_v10 = vpop.f32.mrb[3].mxu0  ;;  %v512_v11 = vsel %vm405_vm1, %v444_v7, -inf  ;;  %v581_v26 = vpack.c.bf16 %v507_v23, %v507_v23  ;;  %v1011_v27 = vpop.f32.mrb[3].mxu1 }
 0x17f   : > { %513 = vmax.xlane.f32.xlu0 %v512_v11 }
 0x180   : > { %v629_v28 = vsel %vm627_vm2, %v581_v26, 0  ;;  %1042 = vmatprep.subr.msk.bf16.mxu1 %vm627_vm2, %v581_v26 }
 0x181   : > { %1021 = vmatpush3.bf16.msra.mxu1 %v629_v28 }
 0x182   : > { %1034 = vmatprep.subr.bf16.mxu1 %v1378_v0 }
 0x20c   : > { %v514_v16 = vpop.xlane.xlu0 %513 }
 0x20d   : > { %v515_v17 = vsub.f32 %v444_v7, %v514_v16 }
 0x20f   : > { %v516_v18 = vmul.f32 1.442695, %v515_v17 }
 0x211   : > { %1145 = vpow2.f32 %v516_v18 }
 0x21b   : > { %v1146_v19 = vpop.eup %1145 }
 0x21c   : > { %v518_v20 = vpack.c.bf16 %v1146_v19, %v1146_v19 }
 0x21e   : > { %1017 = vmatmul.mubr.msk.bf16.vlgmr.msra.gmra.mrb[4].mxu0 %vm405_vm1, %v518_v20 }
 0x21f   : > { %1027 = vmatpush3.bf16.msra.mxu0 %v1141_v59 }
 0x220   : > { %1028 = vmatprep.subr.bf16.mxu0 %v1142_v60 }
 0x223   : > { %1029 = vmatpush3.bf16.msra.mxu0 %v1142_v60 }
 0x2f1   : > { %v572_v29 = vpop.f32.mrb[4].mxu0 }
 0x2f2   : > { %1147 = vrcp.f32 %v572_v29  ;;  %v1018_v30 = vpop.f32.mrb[5].mxu0 }
 0x2f3   : > { %v575_v31 = vpop.f32.mrb[6].mxu0 }
 0x2f4   : > { %v1019_v32 = vpop.f32.mrb[7].mxu0 }
 0x2fc   : > { %v1148_v33 = vpop.eup %1147 }
 0x2fd   : > { %v579_v34 = vmul.f32 %v1148_v33, %v1146_v19  ;;  %v971_v19 = vld [vmem:[%s1770_s7] ss:$0 sm:$0xff] }
 0x2ff   : > { %v580_v35 = vmul.f32 0.7711054, %v579_v34 }
 0x301   : > { %v582_v36 = vsel %vm405_vm1, %v580_v35, -inf }
 0x302   : > { %v583_v37 = vrot.slane %v582_v36, 4 }
 0x304   : > { %v584_v38 = vmax.f32 %v582_v36, %v583_v37 }
 0x306   : > { %v585_v39 = vrot.slane %v584_v38, 2 }
 0x308   : > { %v586_v40 = vmax.f32 %v584_v38, %v585_v39 }
 0x30a   : > { %v587_v41 = vrot.slane %v586_v40, 1 }
 0x30c   : > { %v588_v42 = vmax.f32 %v586_v40, %v587_v41 }
 0x30e   : > { %v589_v43 = vsub.f32 %v580_v35, %v588_v42 }
 0x310   : > { %v590_v44 = vmul.f32 1.442695, %v589_v43 }
 0x312   : > { %1149 = vpow2.f32 %v590_v44 }
 0x31c   : > { %v1150_v45 = vpop.eup %1149 }
 0x31d   : > { %v603_v46 = vpack.c.bf16 %v1150_v45, %v1150_v45  ;;  %v592_v47 = vsel %vm405_vm1, %v1150_v45, 0.0 }
 0x31e   : > { %v593_v48 = vrot.slane %v592_v47, 4 }
 0x31f   : > { %604 = vxpose.xlu0.c.b16.start.end [1/1] (short) (narrow) %v603_v46, 32 }
 0x320   : > { %v594_v49 = vadd.f32 %v593_v48, %v592_v47 }
 0x322   : > { %v595_v50 = vrot.slane %v594_v49, 2 }
 0x324   : > { %v596_v51 = vadd.f32 %v595_v50, %v594_v49 }
 0x326   : > { %v597_v52 = vrot.slane %v596_v51, 1 }
 0x328   : > { %v598_v53 = vadd.f32 %v597_v52, %v596_v51 }
 0x32a   : > { %1151 = vrcp.f32 %v598_v53 }
 0x334   : > { %v1152_v54 = vpop.eup %1151 }
 0x335   : > { %v600_v55 = vmul.f32 0.7711054, %v1152_v54 }
 0x337   : > { %v601_v56 = vmul.f32 %v600_v55, %v580_v35 }
 0x339   : > { %v602_v18 = vpack.c.bf16 %v601_v56, %v601_v56 }
 0x385   : > { %v612_v57 = vpop.trf.xlu0 }
 0x386   : > { %1022 = vmatprep.mubr.msk.bf16.mxu1 %vm620_vm3, %v612_v57 }
 0x389   : > { %v613_v58 = vpop.trf.xlu0 }
 0x38a   : > { %1023 = vmatmul.mubr.msk.bf16.vlgmr.msra.gmra.mrb[4].mxu1 %vm620_vm3, %v613_v58 }
 0x38b   : > { %1038 = vmatprep.mubr.msk.bf16.mxu1 %vm1379_vm0, %v1378_v0 }
 0x45d   : > { %v1024_v63 = vpop.f32.mrb[4].mxu1 }
 0x45e   : > { %v665_v3 = vpop.f32.mrb[5].mxu1  ;;  %v686_v5 = vmul.f32 %v1024_v63, %v682_v61 }
 0x45f   : > { %v1025_v4 = vpop.f32.mrb[6].mxu1  ;;  %v684_v8 = vmul.f32 %v680_v1, %v665_v3 }
 0x460   : > { %v687_v6 = vmul.f32 %v1025_v4, %v683_v62  ;;  %v668_v7 = vpop.f32.mrb[7].mxu1 }
 0x461   : > { %v685_v9 = vmul.f32 %v681_v2, %v668_v7 }
 0x462   : > { %v689_v10 = vpack.c.bf16 %v687_v6, %v686_v5 }
 0x463   : > { %v688_v11 = vpack.c.bf16 %v685_v9, %v684_v8 }
 0x465   : > { %1030 = vmatprep.mubr.msk.bf16.mxu0 %vm405_vm1, %v688_v11 }
 0x466   : > { %1031 = vmatmul.mubr.msk.bf16.vlgmr.msra.gmra.mrb[8].mxu0 %vm405_vm1, %v689_v10 }
 0x539   : > { %v1032_v13 = vpop.f32.mrb[8].mxu0 }
 0x53a   : > { %v746_v14 = vpop.f32.mrb[9].mxu0 }
 0x53b   : > { %v1033_v15 = vpop.f32.mrb[10].mxu0 }
 0x53c   : > { %v762_v16 = vpack.c.bf16 %v1033_v15, %v1032_v13  ;;  %v749_v12 = vpop.f32.mrb[11].mxu0 }
 0x53d   : > { %v761_v17 = vpack.c.bf16 %v749_v12, %v746_v14 }
 0x53f   : > { %1035 = vmatpush3.bf16.msra.mxu1 %v761_v17 }
 0x540   : > { %1036 = vmatprep.subr.bf16.mxu1 %v1378_v0 }
 0x543   : > { %1037 = vmatpush3.bf16.msra.mxu1 %v762_v16 }
 0x546   : > { %1039 = vmatmul.mubr.msk.bf16.vlgmr.msra.gmra.mrb[8].mxu1 %vm405_vm1, %v602_v18 }
 0x619   : > { %v807_v20 = vpop.f32.mrb[8].mxu1 }
 0x61a   : > { %v808_v21 = vadd.f32 %v971_v19, %v807_v20  ;;  %v1040_v22 = vpop.f32.mrb[9].mxu1 }
 0x61b   : > { %v810_v23 = vpop.f32.mrb[10].mxu1 }
 0x61c   : > { %v813_v0 = vpack.c.bf16 %v808_v21, %v808_v21  ;;  %v1041_v24 = vpop.f32.mrb[11].mxu1 }
 0x61e   : > { %815 = vst.msk [vmem:[%s378_s25] sm:$0xf] %vm814_vm4, %v813_v0 }
 0x61f   : > { %1308 = shalt.err (!%p1305_p0)
}
 0x620   : > { %s1309_s1 = scalar_lea.hbm %s1719_s17, 64  ;;  %s1313_s13 = scalar_lea.hbm %s1771_s8, 128 }
 0x621   : > { %p1310_p2 = scmp.ne.s32.totalorder %s1719_s17, %s1309_s1  ;;  %p1314_p10 = scmp.lt.u32.totalorder %s1719_s17, %s1771_s8 }
 0x622   : > { %p1315_p11 = scmp.lt.u32.totalorder %s1313_s13, %s1309_s1  ;;  %p1317_p6 = scmp.lt.u32.totalorder %s1309_s1, %s1719_s17 }
 0x623   : > { %p1311_p8 = pnand %p1310_p2, %p1791_p5 }
 0x624   : > { %p1316_p1 = por %p1315_p11, %p1314_p10 }
 0x625   : > { %p1312_p4 = pneg %p1311_p8 }
 0x626   : > { %p1318_p7 = por %p1317_p6, %p1316_p1 }
 0x628   : > { %p1319_p9 = pnand %p1318_p7, %p1312_p4 }
 0x62a   : > { %1322 = shalt.err (!%p1319_p9)
}
 0x62b   : > { %1061 = dma.vmem_to_hbm [thread:$0]  (%p1791_p5), %s1721_s26, 64, %s1719_s17, %s817_s11  }
 0x62c PF: > { %s842_s14 = sand.u32 1, %s1357_s27   ;;  %p1792_p12 = scmp.ne.s32.totalorder %s1784_s24, 0 }
 0x62d   : > { %p1793_p3 = scmp.ge.s32.totalorder %s1369_s30, 2  ;;  %s843_s22 = scalar_lea.sflag [#allocation4], %s842_s14 }
 0x62f   : > { %p1081_p13 = pnand %p1793_p3, %p1792_p12 }
 0x631   : > { %1352 = dma.done.wait (!%p1081_p13), %s843_s22, 64  }
 0x632   : > { %1354 = vsyncadd (!%p1081_p13), %s843_s22, 4294967232  ;;  %p23_p0 = scmp.ge.s32.totalorder %s1578_s23, 4   ;;  %s1794_s27 = smov %s1361_s28 }
 0x633   : > { %s1795_s28 = smov %s1365_s29  ;;  %s1796_s29 = smov %s1589_s21 }
 0x634   : > { %s1797_s30 = smov %s1578_s23  ;;  %25 = sbr.rel (!%p23_p0) target bundleno = 9 (0x9), region = 113 }
 0x63b   :  { %848 = vsyncpa [#allocation3], 1 }
 0x63c   :  { %850 = vsyncpa [#allocation3 + $0x1], 1 }
 0x63d   :  { %851 = vsyncpa [#allocation6], 1 }
 0x63e   :  { %852 = vsyncpa [#allocation9], 1 }
 0x63f   :  { %853 = vsyncpa [#allocation4], 1 }
 0x640   :  { %855 = vsyncpa [#allocation4 + $0x1], 1 }

</bundles_post_ra>
